<compile_context>
chip_gen: v6e
topology: v6e:2x2x1
jax: 0.10.0
libtpu: 0.0.40
codegen_flags: <defaults>
</compile_context>

<pallas_src>
import functools

import jax
import jax.numpy as jnp
from jax.experimental import pallas as pl
from jax.experimental.pallas import tpu as pltpu


def _soft_iou_kernel(pred_ref, label_ref, num_ref, den_ref, *,
                     from_sigmoid, ignore_label, total_rows, tile_r, ragged):
    r = pl.program_id(1)

    @pl.when(r == 0)
    def _():
        num_ref[...] = jnp.zeros_like(num_ref)
        den_ref[...] = jnp.zeros_like(den_ref)

    pred = pred_ref[0]      # (tile_r, 128), native dtype
    label = label_ref[0]    # (tile_r, 128), native dtype

    # sample_weight = (label != ignore_label), computed in the label's dtype.
    valid = label != jnp.asarray(ignore_label, dtype=label.dtype)
    if ragged:
        # Only the last row-chunk can overhang the true feature extent; the
        # compare is one cheap VPU op so it just runs every step.
        row = jax.lax.broadcasted_iota(jnp.int32, (tile_r, 128), 0)
        valid = jnp.logical_and(valid, r * tile_r + row < total_rows)

    pred = pred.astype(jnp.float32)
    label = label.astype(jnp.float32)
    if not from_sigmoid:
        pred = jax.nn.sigmoid(pred)

    # where() (select) also guards against NaN/garbage in masked-out lanes.
    num_t = jnp.where(valid, pred * label, 0.0)
    den_t = jnp.where(valid, jnp.maximum(pred, label), 0.0)

    # Reduce over the sublane axis only: elementwise vreg adds + a tiny
    # intra-vreg reduce.  The 128-lane reduce is deferred to the wrapper.
    num_ref[...] += jnp.sum(num_t, axis=0, keepdims=True)[None]
    den_ref[...] += jnp.sum(den_t, axis=0, keepdims=True)[None]


def soft_iou(pred, label, *, from_sigmoid=False, ignore_label=-1,
             eps=1e-8, vmem_budget_bytes=24 * 1024 * 1024):
    """Pallas SoftIoU loss. pred: (N, C, H, W); label has the same total size.

    Returns per-sample loss of shape (N,), float32 (matches the torch module).
    """
    N = pred.shape[0]
    F = int(pred.size) // N

    label = label.reshape(pred.shape)           # torch: label.view(pred.size())
    pred2 = pred.reshape(N, F)
    label2 = label.reshape(N, F)

    # Fold features into fully packed 128-lane rows (free contiguous reshape).
    F128 = pl.cdiv(F, 128) * 128
    if F128 != F:
        # Rare ragged-lane case (F not a multiple of 128): pad the tail with
        # ignore_label so it drops out of both sums.  Costs one extra HBM pass
        # but only in this uncommon configuration.
        pred2 = jnp.pad(pred2, ((0, 0), (0, F128 - F)))
        label2 = jnp.pad(label2, ((0, 0), (0, F128 - F)),
                         constant_values=jnp.asarray(ignore_label, label2.dtype))
    R = F128 // 128
    pred3 = pred2.reshape(N, R, 128)
    label3 = label2.reshape(N, R, 128)

    # Row-chunk size from the VMEM budget: 2 inputs x 2 pipeline buffers.
    bytes_per_row = 128 * 2 * (pred3.dtype.itemsize + label3.dtype.itemsize)
    max_rows = max(8, (vmem_budget_bytes // bytes_per_row) // 8 * 8)
    if R <= max_rows:
        tile_r, ragged = R, False
    else:
        tile_r, ragged = max_rows, (R % max_rows) != 0
    n_r = pl.cdiv(R, tile_r)

    kernel = functools.partial(
        _soft_iou_kernel,
        from_sigmoid=from_sigmoid,
        ignore_label=ignore_label,
        total_rows=R,
        tile_r=tile_r,
        ragged=ragged,
    )

    cost = pl.CostEstimate(
        flops=6 * N * F,
        transcendentals=0 if from_sigmoid else N * F,
        bytes_accessed=N * F * (pred3.dtype.itemsize + label3.dtype.itemsize)
        + 2 * N * 128 * 4,
    )

    num, den = pl.pallas_call(
        kernel,
        out_shape=(jax.ShapeDtypeStruct((N, 1, 128), jnp.float32),
                   jax.ShapeDtypeStruct((N, 1, 128), jnp.float32)),
        grid_spec=pltpu.PrefetchScalarGridSpec(
            num_scalar_prefetch=0,
            grid=(N, n_r),
            in_specs=[
                pl.BlockSpec((1, tile_r, 128), lambda n, r: (n, r, 0)),
                pl.BlockSpec((1, tile_r, 128), lambda n, r: (n, r, 0)),
            ],
            out_specs=[
                pl.BlockSpec((1, 1, 128), lambda n, r: (n, 0, 0)),
                pl.BlockSpec((1, 1, 128), lambda n, r: (n, 0, 0)),
            ],
        ),
        compiler_params=pltpu.CompilerParams(
            dimension_semantics=("parallel", "arbitrary"),
            vmem_limit_bytes=32 * 1024 * 1024,
        ),
        cost_estimate=cost,
    )(pred3, label3)

    # Tiny final reduce (N x 128 floats each) + the loss assembly.
    num = jnp.sum(num, axis=(1, 2))
    den = jnp.sum(den, axis=(1, 2))
    return 1.0 - num / (den + eps)


def _soft_iou_ref(pred, label, *, from_sigmoid=False, ignore_label=-1):
    label = label.reshape(pred.shape).astype(jnp.float32)
    pred = pred.astype(jnp.float32)
    w = (label != ignore_label).astype(jnp.float32)
    if not from_sigmoid:
        pred = jax.nn.sigmoid(pred)
    num = jnp.sum(pred * label * w, axis=(1, 2, 3))
    den = jnp.sum(jnp.maximum(pred, label) * w, axis=(1, 2, 3))
    return 1.0 - num / (den + 1e-8)


if __name__ == "__main__":
    key = jax.random.PRNGKey(0)
    k_pred, k_lab, k_ign = jax.random.split(key, 3)

    N, C, H, W = 2, 4, 16, 16
    pred = jax.random.normal(k_pred, (N, C, H, W), dtype=jnp.float32)
    # binary labels in {0, 1}, with some positions set to ignore_label (-1)
    label = (jax.random.uniform(k_lab, (N, C, H, W)) > 0.5).astype(jnp.float32)
    ignore_mask = jax.random.uniform(k_ign, (N, C, H, W)) < 0.1
    label = jnp.where(ignore_mask, -1.0, label)

    loss = soft_iou(pred, label, from_sigmoid=False, ignore_label=-1)
    loss = jax.block_until_ready(loss)

    ref = _soft_iou_ref(pred, label, from_sigmoid=False, ignore_label=-1)
    assert loss.shape == (N,)
    assert jnp.allclose(loss, ref, atol=1e-5, rtol=1e-5), (loss, ref)

    # from_sigmoid=True path (pred already a probability).
    prob = jax.nn.sigmoid(pred)
    loss_s = jax.block_until_ready(
        soft_iou(prob, label, from_sigmoid=True, ignore_label=-1))
    ref_s = _soft_iou_ref(prob, label, from_sigmoid=True, ignore_label=-1)
    assert jnp.allclose(loss_s, ref_s, atol=1e-5, rtol=1e-5), (loss_s, ref_s)

    # bf16 inputs exercise the in-kernel cast path (no wrapper-side astype).
    pred_bf16 = pred.astype(jnp.bfloat16)
    loss_bf = jax.block_until_ready(
        soft_iou(pred_bf16, label, from_sigmoid=False, ignore_label=-1))
    ref_bf = _soft_iou_ref(pred_bf16.astype(jnp.float32), label,
                           from_sigmoid=False, ignore_label=-1)
    assert jnp.allclose(loss_bf, ref_bf, atol=1e-3, rtol=1e-3), (loss_bf, ref_bf)

    print("KERNEL_OK")
</pallas_src>

<mosaic_0001>
module attributes {stable_mosaic.version = 11 : i64} {
  func.func @_soft_iou_kernel(%arg0: i32, %arg1: i32, %arg2: memref<1x8x128xf32, #tpu.memory_space<vmem>>, %arg3: memref<1x8x128xf32, #tpu.memory_space<vmem>>, %arg4: memref<1x1x128xf32, #tpu.memory_space<vmem>>, %arg5: memref<1x1x128xf32, #tpu.memory_space<vmem>>) attributes {dimension_semantics = [#tpu.dimension_semantics<parallel>, #tpu.dimension_semantics<arbitrary>], iteration_bounds = array<i64: 2, 1>, scalar_prefetch = 0 : i64, scratch_operands = 0 : i64, tpu.core_type = #tpu.core_type<tc>, window_params = [{transform_indices = @transform_0, window_bounds = array<i64: 1, 8, 128>}, {transform_indices = @transform_1, window_bounds = array<i64: 1, 8, 128>}, {transform_indices = @transform_2, window_bounds = array<i64: 1, 1, 128>}, {transform_indices = @transform_3, window_bounds = array<i64: 1, 1, 128>}]} {
    %c0_i32 = arith.constant 0 : i32
    %0 = arith.cmpi eq, %arg1, %c0_i32 : i32
    %1 = arith.extui %0 : i1 to i32
    %c0_i32_0 = arith.constant 0 : i32
    %2 = arith.cmpi ne, %1, %c0_i32_0 : i32
    scf.if %2 {
      %cst_23 = arith.constant 0.000000e+00 : f32
      %32 = vector.broadcast %cst_23 : f32 to vector<1x1x128xf32>
      %c0_24 = arith.constant 0 : index
      %c0_25 = arith.constant 0 : index
      %c0_26 = arith.constant 0 : index
      %33 = vector.load %arg4[%c0_24, %c0_25, %c0_26] : memref<1x1x128xf32, #tpu.memory_space<vmem>>, vector<1x1x128xf32>
      tpu.vector_store %arg4[%c0_24, %c0_25, %c0_26], %32 {strides = array<i32>} : memref<1x1x128xf32, #tpu.memory_space<vmem>>, vector<1x1x128xf32>,
      %cst_27 = arith.constant 0.000000e+00 : f32
      %34 = vector.broadcast %cst_27 : f32 to vector<1x1x128xf32>
      %c0_28 = arith.constant 0 : index
      %c0_29 = arith.constant 0 : index
      %c0_30 = arith.constant 0 : index
      %35 = vector.load %arg5[%c0_28, %c0_29, %c0_30] : memref<1x1x128xf32, #tpu.memory_space<vmem>>, vector<1x1x128xf32>
      tpu.vector_store %arg5[%c0_28, %c0_29, %c0_30], %34 {strides = array<i32>} : memref<1x1x128xf32, #tpu.memory_space<vmem>>, vector<1x1x128xf32>,
    } else {
    }
    %c0 = arith.constant 0 : index
    %c0_1 = arith.constant 0 : index
    %c0_2 = arith.constant 0 : index
    %3 = vector.load %arg2[%c0, %c0_1, %c0_2] : memref<1x8x128xf32, #tpu.memory_space<vmem>>, vector<1x8x128xf32>
    %4 = vector.shape_cast %3 : vector<1x8x128xf32> to vector<8x128xf32>
    %c0_3 = arith.constant 0 : index
    %c0_4 = arith.constant 0 : index
    %c0_5 = arith.constant 0 : index
    %5 = vector.load %arg3[%c0_3, %c0_4, %c0_5] : memref<1x8x128xf32, #tpu.memory_space<vmem>>, vector<1x8x128xf32>
    %6 = vector.shape_cast %5 : vector<1x8x128xf32> to vector<8x128xf32>
    %cst = arith.constant -1.000000e+00 : f32
    %7 = vector.broadcast %cst : f32 to vector<8x128xf32>
    %8 = arith.cmpf one, %6, %7 : vector<8x128xf32>
    %9 = arith.negf %4 : vector<8x128xf32>
    %10 = math.exp %9 : vector<8x128xf32>
    %cst_6 = arith.constant 1.000000e+00 : f32
    %11 = vector.broadcast %cst_6 : f32 to vector<8x128xf32>
    %12 = arith.addf %11, %10 : vector<8x128xf32>
    %13 = arith.divf %11, %12 : vector<8x128xf32>
    %14 = arith.mulf %13, %6 : vector<8x128xf32>
    %cst_7 = arith.constant 0.000000e+00 : f32
    %15 = vector.broadcast %cst_7 : f32 to vector<8x128xf32>
    %16 = arith.select %8, %14, %15 : vector<8x128xi1>, vector<8x128xf32>
    %17 = arith.maximumf %13, %6 : vector<8x128xf32>
    %cst_8 = arith.constant 0.000000e+00 : f32
    %18 = vector.broadcast %cst_8 : f32 to vector<8x128xf32>
    %19 = arith.select %8, %17, %18 : vector<8x128xi1>, vector<8x128xf32>
    %c0_9 = arith.constant 0 : index
    %c0_10 = arith.constant 0 : index
    %c0_11 = arith.constant 0 : index
    %20 = vector.load %arg4[%c0_9, %c0_10, %c0_11] : memref<1x1x128xf32, #tpu.memory_space<vmem>>, vector<1x1x128xf32>
    %cst_12 = arith.constant dense<0.000000e+00> : vector<128xf32>
    %21 = vector.multi_reduction <add>, %16, %cst_12 [0] : vector<8x128xf32> to vector<128xf32>
    %22 = vector.shape_cast %21 : vector<128xf32> to vector<1x128xf32>
    %23 = vector.shape_cast %22 : vector<1x128xf32> to vector<1x1x128xf32>
    %24 = arith.addf %20, %23 : vector<1x1x128xf32>
    %c0_13 = arith.constant 0 : index
    %c0_14 = arith.constant 0 : index
    %c0_15 = arith.constant 0 : index
    %25 = vector.load %arg4[%c0_13, %c0_14, %c0_15] : memref<1x1x128xf32, #tpu.memory_space<vmem>>, vector<1x1x128xf32>
    tpu.vector_store %arg4[%c0_13, %c0_14, %c0_15], %24 {strides = array<i32>} : memref<1x1x128xf32, #tpu.memory_space<vmem>>, vector<1x1x128xf32>,
    %c0_16 = arith.constant 0 : index
    %c0_17 = arith.constant 0 : index
    %c0_18 = arith.constant 0 : index
    %26 = vector.load %arg5[%c0_16, %c0_17, %c0_18] : memref<1x1x128xf32, #tpu.memory_space<vmem>>, vector<1x1x128xf32>
    %cst_19 = arith.constant dense<0.000000e+00> : vector<128xf32>
    %27 = vector.multi_reduction <add>, %19, %cst_19 [0] : vector<8x128xf32> to vector<128xf32>
    %28 = vector.shape_cast %27 : vector<128xf32> to vector<1x128xf32>
    %29 = vector.shape_cast %28 : vector<1x128xf32> to vector<1x1x128xf32>
    %30 = arith.addf %26, %29 : vector<1x1x128xf32>
    %c0_20 = arith.constant 0 : index
    %c0_21 = arith.constant 0 : index
    %c0_22 = arith.constant 0 : index
    %31 = vector.load %arg5[%c0_20, %c0_21, %c0_22] : memref<1x1x128xf32, #tpu.memory_space<vmem>>, vector<1x1x128xf32>
    tpu.vector_store %arg5[%c0_20, %c0_21, %c0_22], %30 {strides = array<i32>} : memref<1x1x128xf32, #tpu.memory_space<vmem>>, vector<1x1x128xf32>,
    return
  }
  func.func @transform_0(%arg0: i32, %arg1: i32) -> (i32, i32, i32) {
    %c0_i32 = arith.constant 0 : i32
    %c0_i32_0 = arith.constant 0 : i32
    return %arg0, %arg1, %c0_i32 : i32, i32, i32
  }
  func.func @transform_1(%arg0: i32, %arg1: i32) -> (i32, i32, i32) {
    %c0_i32 = arith.constant 0 : i32
    %c0_i32_0 = arith.constant 0 : i32
    return %arg0, %arg1, %c0_i32 : i32, i32, i32
  }
  func.func @transform_2(%arg0: i32, %arg1: i32) -> (i32, i32, i32) {
    %c0_i32 = arith.constant 0 : i32
    %c0_i32_0 = arith.constant 0 : i32
    %c0_i32_1 = arith.constant 0 : i32
    return %arg0, %c0_i32, %c0_i32_0 : i32, i32, i32
  }
  func.func @transform_3(%arg0: i32, %arg1: i32) -> (i32, i32, i32) {
    %c0_i32 = arith.constant 0 : i32
    %c0_i32_0 = arith.constant 0 : i32
    %c0_i32_1 = arith.constant 0 : i32
    return %arg0, %c0_i32, %c0_i32_0 : i32, i32, i32
  }
}

</mosaic_0001>

<bundles_post_ra>
// kernel: tpu_custom_call.1
= control target key start
LH: loop header
LB: loop body
LE: loop exit
PB: predicated region body
PF: predicated region fallthrough
CT: control target
= control target key end

     0   :  { %9 = vsyncpa [#allocation3], 0  ;;  %s949_s0 = inlined_call_operand.hbm [shape: f32[2,8,128], index: 0, kind: input, shape index: {}]   ;;  %s950_s1 = inlined_call_operand.hbm [shape: f32[2,8,128], index: 1, kind: input, shape index: {}]   ;;  %s951_s2 = inlined_call_operand.hbm [shape: f32[2,1,128], index: 2, kind: output, shape index: {0}]   ;;  %s952_s3 = inlined_call_operand.hbm [shape: f32[2,1,128], index: 3, kind: output, shape index: {1}]  }
   0x1   :  { %11 = vsyncpa [#allocation3 + $0x1], 0 }
   0x2   :  { %12 = vsyncpa [#allocation6], 0 }
   0x3   :  { %14 = vsyncpa [#allocation6 + $0x1], 0 }
   0x4   :  { %15 = vsyncpa [#allocation4], 0 }
   0x5   :  { %17 = vsyncpa [#allocation4 + $0x1], 0 }
   0x6   :  { %18 = vsyncpa [#allocation9], 0 }
   0x7   :  { %20 = vsyncpa [#allocation9 + $0x1], 0  ;;  %s734_s12 = smov 0   ;;  %s736_s13 = smov 0  }
   0x8   :  { %s738_s14 = smov 0   ;;  %s740_s15 = smov 0  }
   0x9   :  { %s742_s16 = smov 0   ;;  %s744_s17 = smov 0  }
   0xa LB: > { %s444_s18 = sadd.s32 4294967295, %s707_s17   ;;  %s445_s19 = sadd.s32 4294967294, %s707_s17   ;;  %s707_s17 = sphi %s744_s17, %s26_s17   ;;  %s703_s16 = sphi %s742_s16, %s964_s16   ;;  %s699_s15 = sphi %s740_s15, %s963_s15   ;;  %s695_s14 = sphi %s738_s14, %s962_s14   ;;  %s691_s13 = sphi %s736_s13, %s961_s13   ;;  %s687_s12 = sphi %s734_s12, %s960_s12  }
   0xb   : > { %s38_s20 = sadd.s32 1, %s703_s16  ;;  %s47_s21 = sadd.s32 1, %s695_s14 }
   0xc   : > { %p40_p0 = scmp.ge.s32.totalorder %s38_s20, 2  ;;  %p54_p1 = scmp.ne.s32.totalorder %s695_s14, %s691_s13 }
   0xd   : > { %p55_p2 = scmp.eq.s32.totalorder %s707_s17, 0  ;;  %p60_p3 = scmp.ne.s32.totalorder %s691_s13, %s687_s12 }
   0xe   : > { %s966_s20 = smov (%p40_p0, %s38_s20), 0  ;;  %p61_p5 = scmp.eq.s32.totalorder %s444_s18, 0 }
   0xf   : > { %p775_p4 = por %p55_p2, %p54_p1  ;;  %s42_s23 = ssub.s32 %s703_s16, %s966_s20 }
  0x10   : > { %p112_p6 = scmp.eq.s32.totalorder %s444_s18, 1  ;;  %p45_p7 = scmp.eq.s32.totalorder %s42_s23, 0 }
  0x11   : > { %p781_p8 = por %p61_p5, %p60_p3  ;;  %p118_p10 = scmp.eq.s32.totalorder %s445_s19, 1 }
  0x12   : > { %p785_p9 = por %p112_p6, %p54_p1  ;;  %p482_p13 = scmp.lt.s32.totalorder %s707_s17, 2 }
  0x13   : > { %s790_s26 = scalar_select %p45_p7, %s695_s14, %s47_s21  }
  0x14   : > { %p792_p11 = por %p118_p10, %p60_p3  ;;  %s799_s28 = sand.u32 1, %s695_s14  }
  0x15   : > { %s448_s29 = sshll.u32 %s799_s28, 3  ;;  %s449_s30 = sshll.u32 %s703_s16, 7 }
  0x16   : > { %s174_s6 = scalar_lea.hbm %s949_s0, %s449_s30  ;;  %s168_s7 = scalar_lea.vmem [#allocation2], %s448_s29 }
  0x17   : > { %s176_s8 = sshll.u32 %s168_s7, 4  ;;  %p808_p0 = pnand %p482_p13, %p775_p4  ;;  %s177_s8 = int_to_ptr.vmem [resolvable:$true] %s176_s8 }
  0x18   : > { %p452_p1 = scmp.ge.s32.totalorder %s707_s17, 1  ;;  %p200_p2 = scmp.lt.s32.totalorder %s707_s17, 3 }
  0x19   : > { %s165_s10 = scalar_lea.sflag [#allocation3], %s799_s28  ;;  %p539_p3 = pneg %p808_p0 }
  0x1a   : > { %s550_s11 = scalar_lea.vmem %s177_s8, 128  ;;  %s709_s18 = smov [#allocation2]  }
  0x1b   : > { %p551_p5 = scmp.ne.s32.totalorder %s177_s8, %s550_s11  ;;  %s555_s19 = sshll.u32 %s709_s18, 4  ;;  %s556_s19 = int_to_ptr.vmem [resolvable:$false] %s555_s19 }
  0x1c   : > { %s557_s21 = scalar_lea.vmem %s556_s19, 256  ;;  %p558_p4 = scmp.lt.s32.totalorder %s177_s8, %s556_s19 }
  0x1d   : > { %p553_p6 = pnand %p551_p5, %p539_p3  ;;  %p559_p10 = scmp.lt.s32.totalorder %s557_s21, %s550_s11 }
  0x1f   : > { %p554_p7 = pneg %p553_p6  ;;  %p560_p13 = por %p559_p10, %p558_p4 }
  0x21   : > { %p561_p12 = pnand %p560_p13, %p554_p7 }
  0x23   : > { %564 = shalt.err (!%p561_p12)
}
  0x24   : > { %471 = dma.hbm_to_vmem [thread:$0]  (!%p808_p0), %s174_s6, 128, %s177_s8, %s165_s10  }
  0x25   : > { %p826_p5 = pnand %p452_p1, %p200_p2  ;;  %s193_s5 = scalar_lea.hbm %s950_s1, %s449_s30 }
  0x26   : > { %s187_s7 = scalar_lea.vmem [#allocation5], %s448_s29  ;;  %s184_s18 = scalar_lea.sflag [#allocation6], %s799_s28 }
  0x27   : > { %s195_s11 = sshll.u32 %s187_s7, 4  ;;  %s710_s6 = smov [#allocation5]   ;;  %s196_s11 = int_to_ptr.vmem [resolvable:$true] %s195_s11 }
  0x28   : > { %s578_s19 = scalar_lea.vmem %s196_s11, 128  ;;  %s583_s8 = sshll.u32 %s710_s6, 4  ;;  %s584_s8 = int_to_ptr.vmem [resolvable:$false] %s583_s8 }
  0x29   : > { %p579_p12 = scmp.ne.s32.totalorder %s196_s11, %s578_s19  ;;  %s585_s10 = scalar_lea.vmem %s584_s8, 256 }
  0x2a   : > { %p586_p1 = scmp.lt.s32.totalorder %s196_s11, %s584_s8  ;;  %p587_p2 = scmp.lt.s32.totalorder %s585_s10, %s578_s19 }
  0x2b   : > { %p581_p6 = pnand %p579_p12, %p539_p3 }
  0x2c   : > { %p588_p4 = por %p587_p2, %p586_p1 }
  0x2d   : > { %p582_p7 = pneg %p581_p6 }
  0x2f   : > { %p589_p10 = pnand %p588_p4, %p582_p7 }
  0x31   : > { %592 = shalt.err (!%p589_p10)
}
  0x32   : > { %474 = dma.hbm_to_vmem [thread:$0]  (!%p808_p0), %s193_s5, 128, %s196_s11, %s184_s18  }
  0x33   : > { %204 = sbr.rel (%p826_p5) target bundleno = 144 (0x90), region = 28  ;;  %s842_s28 = sand.u32 (!%p826_p5), 1, %s691_s13  }
  0x34   : > { %s453_s29 = sshll.u32 (!%p826_p5), %s842_s28, 3  ;;  %s207_s30 = scalar_lea.sflag (!%p826_p5), [#allocation3], %s842_s28 }
  0x35   : > { %s210_s21 = scalar_lea.vmem (!%p826_p5), [#allocation2], %s453_s29 }
  0x38   : > { %670 = dma.done.wait (%p781_p8), %s207_s30, 128  }
  0x39   : > { %672 = vsyncadd (%p781_p8), %s207_s30, 4294967168  ;;  %s216_s9 = scalar_lea.sflag [#allocation6], %s842_s28  ;;  %s219_s23 = scalar_lea.vmem [#allocation5], %s453_s29 }
  0x3a   : > { %674 = dma.done.wait (%p781_p8), %s216_s9, 128  }
  0x3b   : > { %676 = vsyncadd (%p781_p8), %s216_s9, 4294967168  ;;  %s856_s22 = scalar_lea.vmem [#allocation7], %s842_s28  ;;  %v711_v0 = vmov 0.0   ;;  %s860_s4 = scalar_lea.vmem [#allocation8], %s842_s28  ;;  %v256_v1 = vld [vmem:[%s210_s21] sm:$0xff]  ;;  %v257_v5 = vld [vmem:[%s219_s23] sm:$0xff] }
  0x3c   : > { %254 = vst [vmem:[%s856_s22] sm:$0x1] %v711_v0  ;;  %255 = vst [vmem:[%s860_s4] sm:$0x1] %v711_v0  ;;  %v455_v2 = vmul.f32 -1.442695, %v256_v1  ;;  %vm258_vm0 = vcmp.ne.f32.partialorder %v257_v5, -1.0  ;;  %s456_s24 = sshll.u32 %s699_s15, 4 }
  0x3d   : > { %s304_s5 = sshll.u32 %s856_s22, 4  ;;  %s317_s7 = sshll.u32 %s860_s4, 4  ;;  %s873_s5 = int_to_ptr.vmem [resolvable:$true] %s304_s5  ;;  %s880_s7 = int_to_ptr.vmem [resolvable:$true] %s317_s7 }
  0x3e   : > { %533 = vpow2.f32 %v455_v2  ;;  %s871_s19 = scalar_lea.hbm %s951_s2, %s456_s24  ;;  %s878_s15 = scalar_lea.hbm %s952_s3, %s456_s24 }
  0x3f   : > { %s288_s10 = scalar_lea.sflag [#allocation4], %s842_s28  ;;  %s593_s29 = scalar_lea.vmem %s873_s5, 16 }
  0x40   : > { %p594_p8 = scmp.ne.s32.totalorder %s873_s5, %s593_s29  ;;  %s712_s30 = smov [#allocation7]  }
  0x41   : > { %s597_s21 = sshll.u32 %s712_s30, 4  ;;  %s598_s21 = int_to_ptr.vmem [resolvable:$false] %s597_s21 }
  0x42   : > { %p595_p0 = pnand %p594_p8, %p785_p9  ;;  %s599_s9 = scalar_lea.vmem %s598_s21, 32 }
  0x43   : > { %v269_v21 = vld [vmem:[%s856_s22] sm:$0x1]  ;;  %p600_p13 = scmp.lt.s32.totalorder %s873_s5, %s598_s21  ;;  %p601_p5 = scmp.lt.s32.totalorder %s599_s9, %s593_s29 }
  0x44   : > { %v278_v22 = vld [vmem:[%s860_s4] sm:$0x1]  ;;  %p596_p3 = pneg %p595_p0 }
  0x45   : > { %p602_p12 = por %p601_p5, %p600_p13 }
  0x47   : > { %p603_p6 = pnand %p602_p12, %p596_p3 }
  0x4b   : > { %v534_v3 = vpop.eup %533 }
  0x4c   : > { %v262_v4 = vadd.f32 1.0, %v534_v3 }
  0x4e   : > { %535 = vrcp.f32 %v262_v4 }
  0x5b   : > { %v536_v6 = vpop.eup %535 }
  0x5c   : > { %v265_v7 = vmul.f32 %v536_v6, %v257_v5  ;;  %v267_v8 = vmax.f32 %v536_v6, %v257_v5 }
  0x5e   : > { %v266_v9 = vsel %vm258_vm0, %v265_v7, 0.0  ;;  %v268_v10 = vsel %vm258_vm0, %v267_v8, 0.0 }
  0x5f   : > { %v270_v11 = vrot.slane %v266_v9, 4  ;;  %v279_v12 = vrot.slane %v268_v10, 4 }
  0x61   : > { %v271_v13 = vadd.f32 %v270_v11, %v266_v9  ;;  %v280_v14 = vadd.f32 %v279_v12, %v268_v10 }
  0x63   : > { %v272_v15 = vrot.slane %v271_v13, 2  ;;  %v281_v16 = vrot.slane %v280_v14, 2 }
  0x65   : > { %v273_v17 = vadd.f32 %v272_v15, %v271_v13  ;;  %v282_v18 = vadd.f32 %v281_v16, %v280_v14 }
  0x67   : > { %v274_v19 = vrot.slane %v273_v17, 1  ;;  %v283_v20 = vrot.slane %v282_v18, 1 }
  0x69   : > { %v275_v23 = vadd.f32 %v274_v19, %v273_v17  ;;  %v284_v24 = vadd.f32 %v283_v20, %v282_v18 }
  0x6b   : > { %v276_v25 = vadd.f32 %v275_v23, %v269_v21  ;;  %v285_v26 = vadd.f32 %v284_v24, %v278_v22 }
  0x6d   : > { %277 = vst [vmem:[%s856_s22] sm:$0x1] %v276_v25  ;;  %286 = vst [vmem:[%s860_s4] sm:$0x1] %v285_v26 }
  0x6e   : > { %606 = shalt.err (!%p603_p6)
}
  0x6f   : > { %s607_s23 = scalar_lea.hbm %s871_s19, 16  ;;  %s611_s24 = scalar_lea.hbm %s951_s2, 32 }
  0x70   : > { %p608_p7 = scmp.ne.s32.totalorder %s871_s19, %s607_s23  ;;  %p612_p4 = scmp.lt.s32.totalorder %s871_s19, %s951_s2 }
  0x71   : > { %p613_p10 = scmp.lt.s32.totalorder %s611_s24, %s607_s23 }
  0x72   : > { %p609_p1 = pnand %p608_p7, %p785_p9 }
  0x73   : > { %p614_p8 = por %p613_p10, %p612_p4 }
  0x74   : > { %p610_p2 = pneg %p609_p1 }
  0x76   : > { %p615_p0 = pnand %p614_p8, %p610_p2 }
  0x78   : > { %618 = shalt.err (!%p615_p0)
}
  0x79   : > { %464 = dma.vmem_to_hbm [thread:$0]  (%p785_p9), %s873_s5, 16, %s871_s19, %s288_s10  }
  0x7a   : > { %s292_s6 = scalar_lea.sflag [#allocation9], %s842_s28  ;;  %s619_s8 = scalar_lea.vmem %s880_s7, 16 }
  0x7b   : > { %p620_p3 = scmp.ne.s32.totalorder %s880_s7, %s619_s8  ;;  %s713_s29 = smov [#allocation8]  }
  0x7c   : > { %s623_s30 = sshll.u32 %s713_s29, 4  ;;  %s624_s30 = int_to_ptr.vmem [resolvable:$false] %s623_s30 }
  0x7d   : > { %p621_p13 = pnand %p620_p3, %p785_p9  ;;  %s625_s21 = scalar_lea.vmem %s624_s30, 32 }
  0x7e   : > { %p626_p12 = scmp.lt.s32.totalorder %s880_s7, %s624_s30  ;;  %p627_p6 = scmp.lt.s32.totalorder %s625_s21, %s619_s8 }
  0x7f   : > { %p622_p5 = pneg %p621_p13 }
  0x80   : > { %p628_p7 = por %p627_p6, %p626_p12 }
  0x82   : > { %p629_p1 = pnand %p628_p7, %p622_p5 }
  0x84   : > { %632 = shalt.err (!%p629_p1)
}
  0x85   : > { %s633_s5 = scalar_lea.hbm %s878_s15, 16  ;;  %s637_s10 = scalar_lea.hbm %s952_s3, 32 }
  0x86   : > { %p634_p2 = scmp.ne.s32.totalorder %s878_s15, %s633_s5  ;;  %p638_p8 = scmp.lt.s32.totalorder %s878_s15, %s952_s3 }
  0x87   : > { %p639_p0 = scmp.lt.s32.totalorder %s637_s10, %s633_s5 }
  0x88   : > { %p635_p4 = pnand %p634_p2, %p785_p9 }
  0x89   : > { %p640_p3 = por %p639_p0, %p638_p8 }
  0x8a   : > { %p636_p10 = pneg %p635_p4 }
  0x8c   : > { %p641_p13 = pnand %p640_p3, %p636_p10 }
  0x8e   : > { %644 = shalt.err (!%p641_p13)
}
  0x8f   : > { %465 = dma.vmem_to_hbm [thread:$0]  (%p785_p9), %s880_s7, 16, %s878_s15, %s292_s6  }
  0x90 PF: > { %s329_s22 = sand.u32 1, %s687_s12   ;;  %p959_p5 = scmp.ge.s32.totalorder %s707_s17, 2 }
  0x91   : > { %s330_s4 = scalar_lea.sflag [#allocation4], %s329_s22 }
  0x92   : > { %p476_p12 = pnand %p959_p5, %p792_p11 }
  0x94   : > { %p477_p6 = pneg %p476_p12 }
  0x96   : > { %678 = dma.done.wait (%p477_p6), %s330_s4, 16  }
  0x97   : > { %680 = vsyncadd (%p477_p6), %s330_s4, 4294967280  ;;  %s338_s24 = scalar_lea.sflag [#allocation9], %s329_s22 }
  0x98   : > { %682 = dma.done.wait (%p477_p6), %s338_s24, 16  }
  0x99   : > { %684 = vsyncadd (%p477_p6), %s338_s24, 4294967280  ;;  %s26_s17 = sadd.s32 1, %s707_s17   ;;  %s960_s12 = smov %s691_s13 }
  0x9a   : > { %p23_p7 = scmp.ge.s32.totalorder %s26_s17, 4   ;;  %s961_s13 = smov %s695_s14 }
  0x9b   : > { %s962_s14 = smov %s790_s26  ;;  %s963_s15 = smov %s703_s16 }
  0x9c   : > { %s964_s16 = smov %s966_s20  ;;  %25 = sbr.rel (!%p23_p7) target bundleno = 10 (0xa), region = 107 }
  0xa1   :  { %342 = vsyncpa [#allocation3], 1 }
  0xa2   :  { %344 = vsyncpa [#allocation3 + $0x1], 1 }
  0xa3   :  { %345 = vsyncpa [#allocation6], 1 }
  0xa4   :  { %347 = vsyncpa [#allocation6 + $0x1], 1 }
  0xa5   :  { %348 = vsyncpa [#allocation4], 1 }
  0xa6   :  { %350 = vsyncpa [#allocation4 + $0x1], 1 }
  0xa7   :  { %351 = vsyncpa [#allocation9], 1 }
  0xa8   :  { %353 = vsyncpa [#allocation9 + $0x1], 1 }

</bundles_post_ra>
